<compile_context>
chip_gen: v7x
topology: tpu7x:2x2x1
jax: 0.10.0
libtpu: 0.0.40
codegen_flags: <defaults>
</compile_context>

<pallas_src>
import functools

import jax
import jax.numpy as jnp
from jax.experimental import pallas as pl
from jax.experimental.pallas import tpu as pltpu


_LANES = 128
_SUBLANES = 8


def _round_up(n: int, m: int) -> int:
    return ((n + m - 1) // m) * m


def _largest_divisor_tile(total: int, cap: int) -> int:
    """Largest multiple-of-128 divisor of `total` that is <= cap (>=128)."""
    best = _LANES
    t = _LANES
    while t <= total:
        if total % t == 0 and t <= cap:
            best = t
        t += _LANES
    return best


def _vmem_budget_bytes() -> int:
    """Generation-aware VMEM budget (~75% of physical capacity)."""
    cap = 64 * 1024 * 1024
    try:
        cap = int(pltpu.get_tpu_info().vmem_capacity_bytes)
    except Exception:
        pass
    return max(16 * 1024 * 1024, (cap * 3) // 4)


def _resident_spec(shape):
    """BlockSpec for a parameter whose block never changes across the grid.

    Requests single-buffering (default double buffer is pure VMEM waste for a
    constant index_map); falls back gracefully on older jax.
    """
    idx = lambda i, k: (0, 0)
    if hasattr(pl, "Buffered"):
        try:
            return pl.BlockSpec(shape, idx, pipeline_mode=pl.Buffered(1))
        except TypeError:
            pass
    return pl.BlockSpec(shape, idx)


def _fused_mlp_kernel(*refs, n_layers: int):
    # refs = (x_ref, w0, b0, w1, b1, ..., o_ref, acc_ref)
    x_ref = refs[0]
    o_ref = refs[-2]
    acc_ref = refs[-1]
    params = refs[1:-2]

    k = pl.program_id(1)
    nk = pl.num_programs(1)

    @pl.when(k == 0)
    def _init():
        acc_ref[...] = jnp.zeros_like(acc_ref)

    # Layer 0: K-tiled bf16 matmul on the MXU, f32 accumulation in VMEM scratch.
    acc_ref[...] += jnp.dot(
        x_ref[...].astype(jnp.bfloat16),
        params[0][...],  # stored as bf16
        preferred_element_type=jnp.float32,
    )

    @pl.when(k == nk - 1)
    def _finalize():
        h = acc_ref[...] + params[1][...]  # bias add in f32
        if n_layers > 1:
            h = jnp.maximum(h, 0.0)
        for i in range(1, n_layers):
            w_ref = params[2 * i]
            b_ref = params[2 * i + 1]
            h = (
                jnp.dot(
                    h.astype(jnp.bfloat16),
                    w_ref[...],  # bf16
                    preferred_element_type=jnp.float32,
                )
                + b_ref[...]
            )
            if i != n_layers - 1:
                h = jnp.maximum(h, 0.0)
        o_ref[...] = h.astype(o_ref.dtype)


def fused_mlp(x_padded, weights_padded, biases_padded, *, tile_b: int, tk: int,
              vmem_limit: int):
    """Fused MLP forward.

    x_padded:        (B_pad, IN_pad) f32, B_pad % tile_b == 0, IN_pad % tk == 0
    weights_padded:  list of (in_pad_i, out_pad_i) bf16 (already transposed)
    biases_padded:   list of (1, out_pad_i) f32
    """
    B_pad, IN_pad = x_padded.shape
    n_layers = len(weights_padded)
    H1_pad = weights_padded[0].shape[1]
    OUT_pad = weights_padded[-1].shape[1]
    assert B_pad % tile_b == 0 and IN_pad % tk == 0
    nb = B_pad // tile_b
    nk = IN_pad // tk

    in_specs = [pl.BlockSpec((tile_b, tk), lambda i, k: (i, k))]
    inputs = [x_padded]
    # Layer-0 weight is streamed over the K axis (may exceed VMEM otherwise).
    in_specs.append(pl.BlockSpec((tk, H1_pad), lambda i, k: (k, 0)))
    inputs.append(weights_padded[0])
    in_specs.append(_resident_spec(biases_padded[0].shape))
    inputs.append(biases_padded[0])
    for w, b in zip(weights_padded[1:], biases_padded[1:]):
        in_specs.append(_resident_spec(w.shape))
        inputs.append(w)
        in_specs.append(_resident_spec(b.shape))
        inputs.append(b)

    flops = 2 * B_pad * sum(int(w.shape[0]) * int(w.shape[1]) for w in weights_padded)
    bytes_accessed = (
        4 * int(x_padded.size)
        + 2 * sum(int(w.size) for w in weights_padded)          # bf16 weights
        + 4 * sum(int(b.size) for b in biases_padded)           # f32 biases
        + 4 * B_pad * OUT_pad                                   # f32 output
    )

    kernel = functools.partial(_fused_mlp_kernel, n_layers=n_layers)
    return pl.pallas_call(
        kernel,
        out_shape=jax.ShapeDtypeStruct((B_pad, OUT_pad), x_padded.dtype),
        grid=(nb, nk),
        in_specs=in_specs,
        out_specs=pl.BlockSpec((tile_b, OUT_pad), lambda i, k: (i, 0)),
        scratch_shapes=[pltpu.VMEM((tile_b, H1_pad), jnp.float32)],
        compiler_params=pltpu.CompilerParams(
            dimension_semantics=("parallel", "arbitrary"),
            vmem_limit_bytes=int(vmem_limit),
        ),
        cost_estimate=pl.CostEstimate(
            flops=flops, transcendentals=0, bytes_accessed=bytes_accessed
        ),
    )(*inputs)


class FlattenLinearPallas:
    """JAX/Pallas port of FlattenLinear: flatten(start_dim=1) then MLP (ReLU on hidden layers)."""

    def __init__(self, input_dimension, hidden_dims, output_dimension, key):
        self.input_dimension = tuple(input_dimension)
        self.output_dimension = int(output_dimension)
        flattened = 1
        for d in input_dimension:
            flattened *= d
        self.flattened = flattened

        dims = [flattened] + list(hidden_dims) + [output_dimension]
        self.dims = dims
        self.padded_dims = [_round_up(d, _LANES) for d in dims]

        self.weights = []          # logical f32, transposed: (in, out)
        self.biases = []           # logical f32: (out,)
        self.weights_padded = []   # (in_pad, out_pad), zero padded, bf16
        self.biases_padded = []    # (1, out_pad), zero padded, f32
        for i in range(len(dims) - 1):
            fan_in, fan_out = dims[i], dims[i + 1]
            key, kw, kb = jax.random.split(key, 3)
            # deterministic init (mimics torch Linear uniform(-1/sqrt(fan_in), 1/sqrt(fan_in)))
            bound = 1.0 / (fan_in ** 0.5)
            w = jax.random.uniform(kw, (fan_out, fan_in), jnp.float32, -bound, bound)
            b = jax.random.uniform(kb, (fan_out,), jnp.float32, -bound, bound)
            w_t = jnp.transpose(w)  # (in, out)
            self.weights.append(w_t)
            self.biases.append(b)
            in_pad, out_pad = self.padded_dims[i], self.padded_dims[i + 1]
            self.weights_padded.append(
                jnp.pad(w_t, ((0, in_pad - fan_in), (0, out_pad - fan_out))).astype(
                    jnp.bfloat16
                )
            )
            self.biases_padded.append(
                jnp.pad(b, (0, out_pad - fan_out)).reshape(1, out_pad)
            )

    def _footprint_bytes(self, tile_b: int, tk: int) -> int:
        """Estimated VMEM footprint per grid step."""
        H1 = self.padded_dims[1]
        OUT = self.padded_dims[-1]
        max_h = max(self.padded_dims[1:])
        # single-buffered resident params: layer>=1 weights (bf16) + all biases (f32)
        fp = sum(int(w.size) * 2 for w in self.weights_padded[1:])
        fp += sum(int(b.size) * 4 for b in self.biases_padded)
        fp += 2 * tile_b * tk * 4          # x tile (f32), double-buffered
        fp += 2 * tk * H1 * 2              # layer-0 weight tile (bf16), double-buffered
        fp += 2 * tile_b * OUT * 4         # output tile (f32), double-buffered
        fp += tile_b * H1 * 4              # layer-0 accumulator scratch
        fp += 2 * tile_b * max_h * 4       # intermediate activation headroom
        return fp

    def _choose_tiles(self, B8: int, budget: int):
        IN = self.padded_dims[0]
        tile_b = max(_SUBLANES, min(B8, 1024))
        # v7x megacore: keep >=2 "parallel" grid steps when the batch is big
        # enough so both TensorCores get work (no effect on v5e/v6e).
        if B8 // 2 >= 64:
            tile_b = min(tile_b, ((B8 // 2) // _SUBLANES) * _SUBLANES)
        # Shrink the K tile first (keeps layer-0 weight streamed), then the batch tile.
        tk = IN
        while self._footprint_bytes(tile_b, tk) > budget and tk > _LANES:
            tk = _largest_divisor_tile(IN, tk // 2)
        while self._footprint_bytes(tile_b, tk) > budget and tile_b > _SUBLANES:
            tile_b = max(_SUBLANES, ((tile_b // 2) // _SUBLANES) * _SUBLANES)
        # Rebalance batch tiles so round_up(B8, tile_b) wastes as little as possible.
        nb = -(-B8 // tile_b)
        tile_b = max(_SUBLANES, _round_up(-(-B8 // nb), _SUBLANES))
        return tile_b, tk

    def __call__(self, x):
        B = x.shape[0]
        xf = x.reshape(B, -1)
        if xf.dtype != jnp.float32:
            xf = xf.astype(jnp.float32)

        budget = _vmem_budget_bytes()
        B8 = _round_up(B, _SUBLANES)
        tile_b, tk = self._choose_tiles(B8, budget)
        B_pad = _round_up(B8, tile_b)

        pad_b = B_pad - B
        pad_f = self.padded_dims[0] - self.flattened
        if pad_b or pad_f:
            # TODO(synk): handle the ragged feature tail in-kernel to avoid this
            # HBM copy when flattened % 128 != 0 (batch-only pad stays cheap).
            xf = jnp.pad(xf, ((0, pad_b), (0, pad_f)))

        out_padded = fused_mlp(
            xf,
            self.weights_padded,
            self.biases_padded,
            tile_b=tile_b,
            tk=tk,
            vmem_limit=budget,
        )
        return out_padded[:B, : self.output_dimension]


def _reference_forward(model, x):
    """Plain-JAX f32 reference matching the PyTorch module's forward."""
    out = x.reshape(x.shape[0], -1).astype(jnp.float32)
    n = len(model.weights)
    for i in range(n):
        out = out @ model.weights[i] + model.biases[i]
        if i != n - 1:
            out = jnp.maximum(out, 0.0)
    return out


if __name__ == "__main__":
    key = jax.random.PRNGKey(0)
    kx, kparams = jax.random.split(key)

    # small shapes: NCHW input (batch=2, C=4, H=16, W=16) -> flattened dim 1024
    input_dimension = (4, 16, 16)
    hidden_dims = [32, 32]
    output_dimension = 8
    batch = 2
    x = jax.random.normal(kx, (batch,) + input_dimension, dtype=jnp.float32)

    model = FlattenLinearPallas(input_dimension, hidden_dims, output_dimension, kparams)

    y = model(x)
    y = jax.block_until_ready(y)

    # correctness check against plain-JAX f32 reference (bf16 MXU -> loosened tol)
    y_ref = _reference_forward(model, x)
    assert y.shape == (batch, output_dimension)
    assert jnp.allclose(y, y_ref, atol=3e-2, rtol=3e-2), float(jnp.max(jnp.abs(y - y_ref)))

    print("KERNEL_OK")
</pallas_src>

<mosaic_0001>
module attributes {stable_mosaic.version = 11 : i64} {
  func.func @_fused_mlp_kernel(%arg0: i32, %arg1: i32, %arg2: memref<8x1024xf32, #tpu.memory_space<vmem>>, %arg3: memref<1024x128xbf16, #tpu.memory_space<vmem>>, %arg4: memref<1x128xf32, #tpu.memory_space<vmem>>, %arg5: memref<128x128xbf16, #tpu.memory_space<vmem>>, %arg6: memref<1x128xf32, #tpu.memory_space<vmem>>, %arg7: memref<128x128xbf16, #tpu.memory_space<vmem>>, %arg8: memref<1x128xf32, #tpu.memory_space<vmem>>, %arg9: memref<8x128xf32, #tpu.memory_space<vmem>>, %arg10: memref<8x128xf32, #tpu.memory_space<vmem>>) attributes {dimension_semantics = [#tpu.dimension_semantics<parallel>, #tpu.dimension_semantics<arbitrary>], iteration_bounds = array<i64: 1, 1>, scalar_prefetch = 0 : i64, scratch_operands = 1 : i64, tpu.core_type = #tpu.core_type<tc>, window_params = [{transform_indices = @transform_0, window_bounds = array<i64: 8, 1024>}, {transform_indices = @transform_1, window_bounds = array<i64: 1024, 128>}, {pipeline_mode = #tpu.pipeline_mode<synchronous>, transform_indices = @transform_2, window_bounds = array<i64: 1, 128>}, {pipeline_mode = #tpu.pipeline_mode<synchronous>, transform_indices = @transform_3, window_bounds = array<i64: 128, 128>}, {pipeline_mode = #tpu.pipeline_mode<synchronous>, transform_indices = @transform_4, window_bounds = array<i64: 1, 128>}, {pipeline_mode = #tpu.pipeline_mode<synchronous>, transform_indices = @transform_5, window_bounds = array<i64: 128, 128>}, {pipeline_mode = #tpu.pipeline_mode<synchronous>, transform_indices = @transform_6, window_bounds = array<i64: 1, 128>}, {transform_indices = @transform_7, window_bounds = array<i64: 8, 128>}]} {
    %c0_i32 = arith.constant 0 : i32
    %0 = arith.cmpi eq, %arg1, %c0_i32 : i32
    %1 = arith.extui %0 : i1 to i32
    %c0_i32_0 = arith.constant 0 : i32
    %2 = arith.cmpi ne, %1, %c0_i32_0 : i32
    scf.if %2 {
      %cst_10 = arith.constant 0.000000e+00 : f32
      %13 = vector.broadcast %cst_10 : f32 to vector<8x128xf32>
      %c0_11 = arith.constant 0 : index
      %c0_12 = arith.constant 0 : index
      %14 = vector.load %arg10[%c0_11, %c0_12] : memref<8x128xf32, #tpu.memory_space<vmem>>, vector<8x128xf32>
      tpu.vector_store %arg10[%c0_11, %c0_12], %13 {strides = array<i32>} : memref<8x128xf32, #tpu.memory_space<vmem>>, vector<8x128xf32>,
    } else {
    }
    %c0 = arith.constant 0 : index
    %c0_1 = arith.constant 0 : index
    %3 = vector.load %arg10[%c0, %c0_1] : memref<8x128xf32, #tpu.memory_space<vmem>>, vector<8x128xf32>
    %c0_2 = arith.constant 0 : index
    %c0_3 = arith.constant 0 : index
    %4 = vector.load %arg2[%c0_2, %c0_3] : memref<8x1024xf32, #tpu.memory_space<vmem>>, vector<8x1024xf32>
    %5 = arith.truncf %4 : vector<8x1024xf32> to vector<8x1024xbf16>
    %c0_4 = arith.constant 0 : index
    %c0_5 = arith.constant 0 : index
    %6 = vector.load %arg3[%c0_4, %c0_5] : memref<1024x128xbf16, #tpu.memory_space<vmem>>, vector<1024x128xbf16>
    %cst = arith.constant dense<0.000000e+00> : vector<8x128xf32>
    %7 = tpu.matmul %5, %6, %cst {dimension_numbers = #tpu.dot_dimension_numbers<[1], [0], [0], [1], [0, 0, 1, 1], [], []>} : vector<8x1024xbf16>, vector<1024x128xbf16>, vector<8x128xf32> -> vector<8x128xf32>
    %8 = arith.addf %3, %7 : vector<8x128xf32>
    %c0_6 = arith.constant 0 : index
    %c0_7 = arith.constant 0 : index
    %9 = vector.load %arg10[%c0_6, %c0_7] : memref<8x128xf32, #tpu.memory_space<vmem>>, vector<8x128xf32>
    tpu.vector_store %arg10[%c0_6, %c0_7], %8 {strides = array<i32>} : memref<8x128xf32, #tpu.memory_space<vmem>>, vector<8x128xf32>,
    %c0_i32_8 = arith.constant 0 : i32
    %10 = arith.cmpi eq, %arg1, %c0_i32_8 : i32
    %11 = arith.extui %10 : i1 to i32
    %c0_i32_9 = arith.constant 0 : i32
    %12 = arith.cmpi ne, %11, %c0_i32_9 : i32
    scf.if %12 {
      %c0_10 = arith.constant 0 : index
      %c0_11 = arith.constant 0 : index
      %13 = vector.load %arg10[%c0_10, %c0_11] : memref<8x128xf32, #tpu.memory_space<vmem>>, vector<8x128xf32>
      %c0_12 = arith.constant 0 : index
      %c0_13 = arith.constant 0 : index
      %14 = vector.load %arg4[%c0_12, %c0_13] : memref<1x128xf32, #tpu.memory_space<vmem>>, vector<1x128xf32>
      %15 = vector.broadcast %14 : vector<1x128xf32> to vector<8x128xf32>
      %16 = arith.addf %13, %15 : vector<8x128xf32>
      %cst_14 = arith.constant 0.000000e+00 : f32
      %17 = vector.broadcast %cst_14 : f32 to vector<8x128xf32>
      %18 = arith.maximumf %16, %17 : vector<8x128xf32>
      %19 = arith.truncf %18 : vector<8x128xf32> to vector<8x128xbf16>
      %c0_15 = arith.constant 0 : index
      %c0_16 = arith.constant 0 : index
      %20 = vector.load %arg5[%c0_15, %c0_16] : memref<128x128xbf16, #tpu.memory_space<vmem>>, vector<128x128xbf16>
      %cst_17 = arith.constant dense<0.000000e+00> : vector<8x128xf32>
      %21 = tpu.matmul %19, %20, %cst_17 {dimension_numbers = #tpu.dot_dimension_numbers<[1], [0], [0], [1], [0, 0, 1, 1], [], []>} : vector<8x128xbf16>, vector<128x128xbf16>, vector<8x128xf32> -> vector<8x128xf32>
      %c0_18 = arith.constant 0 : index
      %c0_19 = arith.constant 0 : index
      %22 = vector.load %arg6[%c0_18, %c0_19] : memref<1x128xf32, #tpu.memory_space<vmem>>, vector<1x128xf32>
      %23 = vector.broadcast %22 : vector<1x128xf32> to vector<8x128xf32>
      %24 = arith.addf %21, %23 : vector<8x128xf32>
      %cst_20 = arith.constant 0.000000e+00 : f32
      %25 = vector.broadcast %cst_20 : f32 to vector<8x128xf32>
      %26 = arith.maximumf %24, %25 : vector<8x128xf32>
      %27 = arith.truncf %26 : vector<8x128xf32> to vector<8x128xbf16>
      %c0_21 = arith.constant 0 : index
      %c0_22 = arith.constant 0 : index
      %28 = vector.load %arg7[%c0_21, %c0_22] : memref<128x128xbf16, #tpu.memory_space<vmem>>, vector<128x128xbf16>
      %cst_23 = arith.constant dense<0.000000e+00> : vector<8x128xf32>
      %29 = tpu.matmul %27, %28, %cst_23 {dimension_numbers = #tpu.dot_dimension_numbers<[1], [0], [0], [1], [0, 0, 1, 1], [], []>} : vector<8x128xbf16>, vector<128x128xbf16>, vector<8x128xf32> -> vector<8x128xf32>
      %c0_24 = arith.constant 0 : index
      %c0_25 = arith.constant 0 : index
      %30 = vector.load %arg8[%c0_24, %c0_25] : memref<1x128xf32, #tpu.memory_space<vmem>>, vector<1x128xf32>
      %31 = vector.broadcast %30 : vector<1x128xf32> to vector<8x128xf32>
      %32 = arith.addf %29, %31 : vector<8x128xf32>
      %c0_26 = arith.constant 0 : index
      %c0_27 = arith.constant 0 : index
      %33 = vector.load %arg9[%c0_26, %c0_27] : memref<8x128xf32, #tpu.memory_space<vmem>>, vector<8x128xf32>
      tpu.vector_store %arg9[%c0_26, %c0_27], %32 {strides = array<i32>} : memref<8x128xf32, #tpu.memory_space<vmem>>, vector<8x128xf32>,
    } else {
    }
    return
  }
  func.func @transform_0(%arg0: i32, %arg1: i32) -> (i32, i32) {
    %c0_i32 = arith.constant 0 : i32
    return %arg0, %arg1 : i32, i32
  }
  func.func @transform_1(%arg0: i32, %arg1: i32) -> (i32, i32) {
    %c0_i32 = arith.constant 0 : i32
    %c0_i32_0 = arith.constant 0 : i32
    return %arg1, %c0_i32 : i32, i32
  }
  func.func @transform_2(%arg0: i32, %arg1: i32) -> (i32, i32) {
    %c0_i32 = arith.constant 0 : i32
    %c0_i32_0 = arith.constant 0 : i32
    %c0_i32_1 = arith.constant 0 : i32
    return %c0_i32, %c0_i32_0 : i32, i32
  }
  func.func @transform_3(%arg0: i32, %arg1: i32) -> (i32, i32) {
    %c0_i32 = arith.constant 0 : i32
    %c0_i32_0 = arith.constant 0 : i32
    %c0_i32_1 = arith.constant 0 : i32
    return %c0_i32, %c0_i32_0 : i32, i32
  }
  func.func @transform_4(%arg0: i32, %arg1: i32) -> (i32, i32) {
    %c0_i32 = arith.constant 0 : i32
    %c0_i32_0 = arith.constant 0 : i32
    %c0_i32_1 = arith.constant 0 : i32
    return %c0_i32, %c0_i32_0 : i32, i32
  }
  func.func @transform_5(%arg0: i32, %arg1: i32) -> (i32, i32) {
    %c0_i32 = arith.constant 0 : i32
    %c0_i32_0 = arith.constant 0 : i32
    %c0_i32_1 = arith.constant 0 : i32
    return %c0_i32, %c0_i32_0 : i32, i32
  }
  func.func @transform_6(%arg0: i32, %arg1: i32) -> (i32, i32) {
    %c0_i32 = arith.constant 0 : i32
    %c0_i32_0 = arith.constant 0 : i32
    %c0_i32_1 = arith.constant 0 : i32
    return %c0_i32, %c0_i32_0 : i32, i32
  }
  func.func @transform_7(%arg0: i32, %arg1: i32) -> (i32, i32) {
    %c0_i32 = arith.constant 0 : i32
    %c0_i32_0 = arith.constant 0 : i32
    return %arg0, %c0_i32 : i32, i32
  }
}

</mosaic_0001>

<bundles_post_ra>
// kernel: tpu_custom_call.1
= control target key start
LH: loop header
LB: loop body
LE: loop exit
PB: predicated region body
PF: predicated region fallthrough
CT: control target
= control target key end

     0   :  { %12 = vsyncpa [#allocation4], 0  ;;  %s1614_s0 = inlined_call_operand.hbm [shape: f32[8,1024], index: 0, kind: input, shape index: {}]   ;;  %s1615_s1 = inlined_call_operand.hbm [shape: bf16[1024,128], index: 1, kind: input, shape index: {}]   ;;  %s1616_s2 = inlined_call_operand.vmem [shape: f32[1,128], index: 2, kind: input, shape index: {}]   ;;  %s1617_s3 = inlined_call_operand.hbm [shape: bf16[128,128], index: 3, kind: input, shape index: {}]   ;;  %s1618_s4 = inlined_call_operand.vmem [shape: f32[1,128], index: 4, kind: input, shape index: {}]   ;;  %s1619_s5 = inlined_call_operand.hbm [shape: bf16[128,128], index: 5, kind: input, shape index: {}]   ;;  %s1620_s6 = inlined_call_operand.vmem [shape: f32[1,128], index: 6, kind: input, shape index: {}]   ;;  %s1621_s7 = inlined_call_operand.hbm [shape: f32[8,128], index: 7, kind: output, shape index: {}]  }
   0x1   :  { %13 = vsyncpa [#allocation7], 0 }
   0x2   :  { %14 = vsyncpa [#allocation10], 0 }
   0x3   :  { %15 = vsyncpa [#allocation5], 0  ;;  %s1469_s24 = smov [#allocation6]   ;;  %s1351_s28 = scalar_lea.hbm %s1615_s1, 8192 }
   0x4   :  { %s31_s25 = sshll.u32 %s1469_s24, 4  ;;  %p1352_p0 = scmp.ne.s32.totalorder %s1615_s1, %s1351_s28  ;;  %s32_s25 = int_to_ptr.vmem [resolvable:$true] %s31_s25 }
   0x5   :  { %p1355_p1 = scmp.lt.u32.totalorder %s1351_s28, %s1615_s1 }
   0x7   :  { %p1357_p2 = pnand %p1355_p1, %p1352_p0 }
   0x9   :  { %1360 = shalt.err (!%p1357_p2)
}
   0xa   :  { %s1361_s10 = scalar_lea.vmem %s32_s25, 8192  ;;  %p1366_p4 = scmp.lt.s32.totalorder %s32_s25, %s32_s25 }
   0xb   :  { %p1362_p3 = scmp.ne.s32.totalorder %s32_s25, %s1361_s10  ;;  %p1367_p5 = scmp.lt.s32.totalorder %s1361_s10, %s1361_s10 }
   0xd   :  { %p1368_p6 = por %p1367_p5, %p1366_p4 }
   0xf   :  { %p1369_p7 = pnand %p1368_p6, %p1362_p3 }
  0x11   :  { %1372 = shalt.err (!%p1369_p7)
}
  0x12   :  { %s1470_s11 = smov 64   ;;  %s1471_s12 = smov 4  }
  0x13   :  { %37 = dma.hbm_to_vmem [thread:$0]  %s1615_s1, 8192, %s32_s25, [#allocation7], %s1470_s11, %s1470_s11, %s1471_s12  }
  0x14   :  { %s1472_s15 = smov [#allocation3]   ;;  %s1473_s17 = smov [#allocation8]  }
  0x15   :  { %s22_s16 = sshll.u32 %s1472_s15, 4  ;;  %s45_s18 = sshll.u32 %s1473_s17, 4  ;;  %s23_s16 = int_to_ptr.vmem [resolvable:$true] %s22_s16  ;;  %s46_s18 = int_to_ptr.vmem [resolvable:$true] %s45_s18 }
  0x16   :  { %s1373_s21 = scalar_lea.hbm %s1614_s0, 1024 }
  0x17   :  { %p1374_p8 = scmp.ne.s32.totalorder %s1614_s0, %s1373_s21  ;;  %p1377_p9 = scmp.lt.u32.totalorder %s1373_s21, %s1614_s0 }
  0x19   :  { %p1379_p10 = pnand %p1377_p9, %p1374_p8 }
  0x1b   :  { %1382 = shalt.err (!%p1379_p10)
}
  0x1c   :  { %s1383_s1 = scalar_lea.vmem %s23_s16, 1024  ;;  %p1388_p12 = scmp.lt.s32.totalorder %s23_s16, %s23_s16 }
  0x1d   :  { %p1384_p11 = scmp.ne.s32.totalorder %s23_s16, %s1383_s1  ;;  %p1389_p13 = scmp.lt.s32.totalorder %s1383_s1, %s1383_s1 }
  0x1f   :  { %p1390_p0 = por %p1389_p13, %p1388_p12 }
  0x21   :  { %p1391_p1 = pnand %p1390_p0, %p1384_p11 }
  0x23   :  { %1394 = shalt.err (!%p1391_p1)
}
  0x24   :  { %25 = dma.hbm_to_vmem [thread:$0]  %s1614_s0, 1024, %s23_s16, [#allocation4]  }
  0x25   :  { %s1395_s30 = scalar_lea.hbm %s1617_s3, 1024 }
  0x26   :  { %p1396_p2 = scmp.ne.s32.totalorder %s1617_s3, %s1395_s30  ;;  %p1399_p3 = scmp.lt.u32.totalorder %s1395_s30, %s1617_s3 }
  0x28   :  { %p1401_p4 = pnand %p1399_p3, %p1396_p2 }
  0x2a   :  { %1404 = shalt.err (!%p1401_p4)
}
  0x2b   :  { %s1405_s14 = scalar_lea.vmem %s46_s18, 1024  ;;  %p1410_p6 = scmp.lt.s32.totalorder %s46_s18, %s46_s18 }
  0x2c   :  { %p1406_p5 = scmp.ne.s32.totalorder %s46_s18, %s1405_s14  ;;  %p1411_p7 = scmp.lt.s32.totalorder %s1405_s14, %s1405_s14 }
  0x2e   :  { %p1412_p8 = por %p1411_p7, %p1410_p6 }
  0x30   :  { %p1413_p9 = pnand %p1412_p8, %p1406_p5 }
  0x32   :  { %1416 = shalt.err (!%p1413_p9)
}
  0x33   :  { %51 = dma.hbm_to_vmem [thread:$0]  %s1617_s3, 1024, %s46_s18, [#allocation7], %s1470_s11, %s1470_s11, %s1471_s12  }
  0x34   :  { %s1474_s16 = smov [#allocation9]   ;;  %s1417_s21 = scalar_lea.hbm %s1619_s5, 1024 }
  0x35   :  { %s59_s17 = sshll.u32 %s1474_s16, 4  ;;  %p1418_p10 = scmp.ne.s32.totalorder %s1619_s5, %s1417_s21  ;;  %s60_s17 = int_to_ptr.vmem [resolvable:$true] %s59_s17 }
  0x36   :  { %p1421_p11 = scmp.lt.u32.totalorder %s1417_s21, %s1619_s5 }
  0x38   :  { %p1423_p12 = pnand %p1421_p11, %p1418_p10 }
  0x3a   :  { %1426 = shalt.err (!%p1423_p12)
}
  0x3b   :  { %s1427_s1 = scalar_lea.vmem %s60_s17, 1024  ;;  %p1432_p0 = scmp.lt.s32.totalorder %s60_s17, %s60_s17 }
  0x3c   :  { %p1428_p13 = scmp.ne.s32.totalorder %s60_s17, %s1427_s1  ;;  %p1433_p1 = scmp.lt.s32.totalorder %s1427_s1, %s1427_s1 }
  0x3e   :  { %p1434_p2 = por %p1433_p1, %p1432_p0 }
  0x40   :  { %p1435_p3 = pnand %p1434_p2, %p1428_p13 }
  0x42   :  { %1438 = shalt.err (!%p1435_p3)
}
  0x43   :  { %65 = dma.hbm_to_vmem [thread:$0]  %s1619_s5, 1024, %s60_s17, [#allocation10], %s1470_s11, %s1470_s11, %s1471_s12  }
  0x44   :  { %1461 = dma.done.wait [#allocation4], 1024  }
  0x45   :  { %1462 = vsyncadd [#allocation4], 4294966272 }
  0x46   :  { %1463 = dma.done.wait [#allocation7], 9216  }
  0x47   :  { %1464 = vsyncadd [#allocation7], 4294958080 }
  0x48   :  { %1465 = dma.done.wait [#allocation10], 1024  }
  0x49   :  { %1466 = vsyncadd [#allocation10], 4294966272  ;;  %v1271_v0 = vld [vmem:[#allocation6 + $0x40] sm:$0xff]   ;;  %v1275_v4 = vld [vmem:[#allocation6 + $0x48] sm:$0xff]   ;;  %vm1476_vm0 = vmmov 0   ;;  %s1477_s28 = smov [#allocation11]  }
  0x4a   :  { %v1272_v1 = vld [vmem:[#allocation6 + $0xc0] sm:$0xff]   ;;  %1116 = vmatprep.subr.bf16.mxu0 %v1271_v0  ;;  %v1276_v5 = vld [vmem:[#allocation6 + $0xc8] sm:$0xff]   ;;  %v1279_v8 = vld [vmem:[#allocation6 + $0x50] sm:$0xff]   ;;  %s1022_s29 = sshll.u32 %s1477_s28, 4  ;;  %s1023_s29 = int_to_ptr.vmem [resolvable:$true] %s1022_s29 }
  0x4b   :  { %v1273_v2 = vld [vmem:[#allocation6] sm:$0xff]   ;;  %1138 = vmatprep.subr.bf16.mxu1 %v1272_v1  ;;  %v1277_v6 = vld [vmem:[#allocation6 + $0x8] sm:$0xff]   ;;  %v1280_v9 = vld [vmem:[#allocation6 + $0xd0] sm:$0xff]   ;;  %p1444_p5 = scmp.lt.s32.totalorder %s1023_s29, %s1023_s29 }
  0x4c   :  { %v1274_v3 = vld [vmem:[#allocation6 + $0x80] sm:$0xff]   ;;  %1117 = vmatpush3.bf16.msra.mxu0 %v1273_v2  ;;  %v1278_v7 = vld [vmem:[#allocation6 + $0x88] sm:$0xff]   ;;  %v1281_v10 = vld [vmem:[#allocation6 + $0x10] sm:$0xff]  }
  0x4d   :  { %1139 = vmatpush3.bf16.msra.mxu1 %v1274_v3  ;;  %1118 = vmatprep.subr.bf16.mxu0 %v1275_v4  ;;  %v1282_v11 = vld [vmem:[#allocation6 + $0x90] sm:$0xff]   ;;  %v1283_v12 = vld [vmem:[#allocation6 + $0x58] sm:$0xff]   ;;  %v1287_v16 = vld [vmem:[#allocation6 + $0x60] sm:$0xff]  }
  0x4e   :  { %1140 = vmatprep.subr.bf16.mxu1 %v1276_v5  ;;  %v1284_v13 = vld [vmem:[#allocation6 + $0xd8] sm:$0xff]   ;;  %v1288_v17 = vld [vmem:[#allocation6 + $0xe0] sm:$0xff]   ;;  %v1291_v20 = vld [vmem:[#allocation6 + $0x68] sm:$0xff]  }
  0x4f   :  { %v1285_v14 = vld [vmem:[#allocation6 + $0x18] sm:$0xff]   ;;  %v1289_v18 = vld [vmem:[#allocation6 + $0x20] sm:$0xff]   ;;  %v1292_v21 = vld [vmem:[#allocation6 + $0xe8] sm:$0xff]  }
  0x50   :  { %1119 = vmatpush3.bf16.msra.mxu0 %v1277_v6  ;;  %v1286_v15 = vld [vmem:[#allocation6 + $0x98] sm:$0xff]   ;;  %v1290_v19 = vld [vmem:[#allocation6 + $0xa0] sm:$0xff]   ;;  %v1293_v22 = vld [vmem:[#allocation6 + $0x28] sm:$0xff]  }
  0x51   :  { %1141 = vmatpush3.bf16.msra.mxu1 %v1278_v7  ;;  %1120 = vmatprep.subr.bf16.mxu0 %v1279_v8  ;;  %v1294_v23 = vld [vmem:[#allocation6 + $0xa8] sm:$0xff]   ;;  %v1295_v24 = vld [vmem:[#allocation6 + $0x70] sm:$0xff]   ;;  %v1299_v28 = vld [vmem:[#allocation6 + $0x78] sm:$0xff]  }
  0x52   :  { %1142 = vmatprep.subr.bf16.mxu1 %v1280_v9  ;;  %v1296_v25 = vld [vmem:[#allocation6 + $0xf0] sm:$0xff]   ;;  %v1300_v29 = vld [vmem:[#allocation6 + $0xf8] sm:$0xff]   ;;  %v88_v32 = vld [vmem:[#allocation3 + $0x8] sm:$0xff] }
  0x53   :  { %v1297_v26 = vld [vmem:[#allocation6 + $0x30] sm:$0xff]   ;;  %v1301_v30 = vld [vmem:[#allocation6 + $0x38] sm:$0xff]   ;;  %v87_v34 = vld [vmem:[#allocation3] sm:$0xff]  ;;  %v96_v35 = vpack.c.bf16 %v88_v32, %v88_v32 }
  0x54   :  { %1121 = vmatpush3.bf16.msra.mxu0 %v1281_v10  ;;  %v1298_v27 = vld [vmem:[#allocation6 + $0xb0] sm:$0xff]   ;;  %v1302_v31 = vld [vmem:[#allocation6 + $0xb8] sm:$0xff]   ;;  %v95_v37 = vpack.c.bf16 %v87_v34, %v87_v34  ;;  %v1303_v40 = vld [vmem:[#allocation6 + $0x140] sm:$0xff]  }
  0x55   :  { %1143 = vmatpush3.bf16.msra.mxu1 %v1282_v11  ;;  %1122 = vmatprep.subr.bf16.mxu0 %v1283_v12  ;;  %v90_v33 = vld [vmem:[#allocation3 + $0x18] sm:$0xff]  ;;  %v89_v38 = vld [vmem:[#allocation3 + $0x10] sm:$0xff]  ;;  %v1304_v41 = vld [vmem:[#allocation6 + $0x1c0] sm:$0xff]  }
  0x56   :  { %1144 = vmatprep.subr.bf16.mxu1 %v1284_v13  ;;  %v98_v36 = vpack.c.bf16 %v90_v33, %v90_v33  ;;  %v97_v39 = vpack.c.bf16 %v89_v38, %v89_v38  ;;  %647 = vmatprep.mubr.bf16.mxu0 %v96_v35  ;;  %v1305_v42 = vld [vmem:[#allocation6 + $0x100] sm:$0xff]   ;;  %v1307_v44 = vld [vmem:[#allocation6 + $0x148] sm:$0xff]   ;;  %v1311_v48 = vld [vmem:[#allocation6 + $0x150] sm:$0xff]  }
  0x57   :  { %v1306_v43 = vld [vmem:[#allocation6 + $0x180] sm:$0xff]   ;;  %v1308_v45 = vld [vmem:[#allocation6 + $0x1c8] sm:$0xff]   ;;  %v1312_v49 = vld [vmem:[#allocation6 + $0x1d0] sm:$0xff]  }
  0x58   :  { %1123 = vmatpush3.bf16.msra.mxu0 %v1285_v14  ;;  %687 = vmatprep.mubr.bf16.mxu1 %v98_v36  ;;  %v1309_v46 = vld [vmem:[#allocation6 + $0x108] sm:$0xff]   ;;  %v1313_v50 = vld [vmem:[#allocation6 + $0x110] sm:$0xff]   ;;  %v1315_v52 = vld [vmem:[#allocation6 + $0x158] sm:$0xff]  }
  0x59   :  { %1145 = vmatpush3.bf16.msra.mxu1 %v1286_v15  ;;  %1124 = vmatprep.subr.bf16.mxu0 %v1287_v16  ;;  %v1310_v47 = vld [vmem:[#allocation6 + $0x188] sm:$0xff]   ;;  %v1314_v51 = vld [vmem:[#allocation6 + $0x190] sm:$0xff]   ;;  %v1316_v53 = vld [vmem:[#allocation6 + $0x1d8] sm:$0xff]  }
  0x5a   :  { %1146 = vmatprep.subr.bf16.mxu1 %v1288_v17  ;;  %v1317_v54 = vld [vmem:[#allocation6 + $0x118] sm:$0xff]   ;;  %v1319_v56 = vld [vmem:[#allocation6 + $0x160] sm:$0xff]   ;;  %v1323_v60 = vld [vmem:[#allocation6 + $0x168] sm:$0xff]   ;;  %v1475_v17 = vmov 0.0  }
  0x5b   :  { %v1318_v55 = vld [vmem:[#allocation6 + $0x198] sm:$0xff]   ;;  %v1320_v57 = vld [vmem:[#allocation6 + $0x1e0] sm:$0xff]   ;;  %v1324_v61 = vld [vmem:[#allocation6 + $0x1e8] sm:$0xff]  }
  0x5c   :  { %1125 = vmatpush3.bf16.msra.mxu0 %v1289_v18  ;;  %v1321_v58 = vld [vmem:[#allocation6 + $0x120] sm:$0xff]   ;;  %v1325_v62 = vld [vmem:[#allocation6 + $0x128] sm:$0xff]   ;;  %v1327_v0 = vld [vmem:[#allocation6 + $0x170] sm:$0xff]  }
  0x5d   :  { %1147 = vmatpush3.bf16.msra.mxu1 %v1290_v19  ;;  %1126 = vmatprep.subr.bf16.mxu0 %v1291_v20  ;;  %v1322_v59 = vld [vmem:[#allocation6 + $0x1a0] sm:$0xff]   ;;  %v1326_v63 = vld [vmem:[#allocation6 + $0x1a8] sm:$0xff]   ;;  %v1328_v1 = vld [vmem:[#allocation6 + $0x1f0] sm:$0xff]  }
  0x5e   :  { %1148 = vmatprep.subr.bf16.mxu1 %v1292_v21  ;;  %v1329_v2 = vld [vmem:[#allocation6 + $0x130] sm:$0xff]   ;;  %v1331_v4 = vld [vmem:[#allocation6 + $0x178] sm:$0xff]   ;;  %v92_v8 = vld [vmem:[#allocation3 + $0x28] sm:$0xff] }
  0x5f   :  { %v1330_v3 = vld [vmem:[#allocation6 + $0x1b0] sm:$0xff]   ;;  %v1332_v5 = vld [vmem:[#allocation6 + $0x1f8] sm:$0xff]   ;;  %v100_v10 = vpack.c.bf16 %v92_v8, %v92_v8  ;;  %v91_v12 = vld [vmem:[#allocation3 + $0x20] sm:$0xff] }
  0x60   :  { %1127 = vmatpush3.bf16.msra.mxu0 %v1293_v22  ;;  %v1333_v6 = vld [vmem:[#allocation6 + $0x138] sm:$0xff]   ;;  %v93_v13 = vld [vmem:[#allocation3 + $0x30] sm:$0xff]  ;;  %v99_v14 = vpack.c.bf16 %v91_v12, %v91_v12  ;;  %v1335_v16 = vld [vmem:[#allocation8] sm:$0xff]  }
  0x61   :  { %1149 = vmatpush3.bf16.msra.mxu1 %v1294_v23  ;;  %1128 = vmatprep.subr.bf16.mxu0 %v1295_v24  ;;  %v1334_v7 = vld [vmem:[#allocation6 + $0x1b8] sm:$0xff]   ;;  %v101_v15 = vpack.c.bf16 %v93_v13, %v93_v13  ;;  %v1336_v18 = vld [vmem:[#allocation8 + $0x8] sm:$0xff]   ;;  %v1337_v19 = vld [vmem:[#allocation8 + $0x10] sm:$0xff]  }
  0x62   :  { %1150 = vmatprep.subr.bf16.mxu1 %v1296_v25  ;;  %v94_v9 = vld [vmem:[#allocation3 + $0x38] sm:$0xff]  ;;  %v1339_v21 = vld [vmem:[#allocation8 + $0x20] sm:$0xff]   ;;  %v1340_v22 = vld [vmem:[#allocation8 + $0x28] sm:$0xff]  }
  0x63   :  { %v102_v11 = vpack.c.bf16 %v94_v9, %v94_v9  ;;  %v1338_v20 = vld [vmem:[#allocation8 + $0x18] sm:$0xff]   ;;  %v1341_v23 = vld [vmem:[#allocation8 + $0x30] sm:$0xff]   ;;  %v1343_v25 = vld [vmem:[#allocation9] sm:$0xff]  }
  0x64   :  { %1129 = vmatpush3.bf16.msra.mxu0 %v1297_v26  ;;  %v1342_v24 = vld [vmem:[#allocation8 + $0x38] sm:$0xff]   ;;  %v1344_v26 = vld [vmem:[#allocation9 + $0x8] sm:$0xff]  }
  0x65   :  { %1151 = vmatpush3.bf16.msra.mxu1 %v1298_v27  ;;  %1130 = vmatprep.subr.bf16.mxu0 %v1299_v28  ;;  %v1345_v27 = vld [vmem:[#allocation9 + $0x10] sm:$0xff]   ;;  %v1346_v28 = vld [vmem:[#allocation9 + $0x18] sm:$0xff]  }
  0x66   :  { %1152 = vmatprep.subr.bf16.mxu1 %v1300_v29  ;;  %v1347_v29 = vld [vmem:[#allocation9 + $0x20] sm:$0xff]  }
  0x68   :  { %1131 = vmatpush3.bf16.msra.mxu0 %v1301_v30  ;;  %v1348_v30 = vld [vmem:[#allocation9 + $0x28] sm:$0xff]  }
  0x69   :  { %1153 = vmatpush3.bf16.msra.mxu1 %v1302_v31  ;;  %1160 = vmatprep.subr.bf16.mxu0 %v1303_v40 }
  0x6a   :  { %1182 = vmatprep.subr.bf16.mxu1 %v1304_v41 }
  0x6b   :  { %648 = vmatmul.mubr.bf16.vlgmr.msra.gmra.mrb[0].mxu0 %v95_v37 }
  0x6c   :  { %688 = vmatmul.mubr.bf16.vlgmr.msra.gmra.mrb[0].mxu1 %v97_v39  ;;  %1161 = vmatpush3.bf16.msra.mxu0 %v1305_v42 }
  0x6d   :  { %1183 = vmatpush3.bf16.msra.mxu1 %v1306_v43  ;;  %1162 = vmatprep.subr.bf16.mxu0 %v1307_v44 }
  0x6e   :  { %1184 = vmatprep.subr.bf16.mxu1 %v1308_v45  ;;  %727 = vmatprep.mubr.bf16.mxu0 %v100_v10 }
  0x6f   :  { %767 = vmatprep.mubr.bf16.mxu1 %v102_v11 }
  0x70   :  { %1163 = vmatpush3.bf16.msra.mxu0 %v1309_v46 }
  0x71   :  { %1185 = vmatpush3.bf16.msra.mxu1 %v1310_v47  ;;  %1164 = vmatprep.subr.bf16.mxu0 %v1311_v48 }
  0x72   :  { %1186 = vmatprep.subr.bf16.mxu1 %v1312_v49 }
  0x74   :  { %1165 = vmatpush3.bf16.msra.mxu0 %v1313_v50 }
  0x75   :  { %1187 = vmatpush3.bf16.msra.mxu1 %v1314_v51  ;;  %1166 = vmatprep.subr.bf16.mxu0 %v1315_v52 }
  0x76   :  { %1188 = vmatprep.subr.bf16.mxu1 %v1316_v53  ;;  %v1097_v53 = vld [vmem:[%s1616_s2] ss:$0 sm:$0xff] }
  0x78   :  { %1167 = vmatpush3.bf16.msra.mxu0 %v1317_v54 }
  0x79   :  { %1189 = vmatpush3.bf16.msra.mxu1 %v1318_v55  ;;  %1168 = vmatprep.subr.bf16.mxu0 %v1319_v56 }
  0x7a   :  { %1190 = vmatprep.subr.bf16.mxu1 %v1320_v57 }
  0x7c   :  { %1169 = vmatpush3.bf16.msra.mxu0 %v1321_v58  ;;  %v1349_v58 = vld [vmem:[#allocation9 + $0x30] sm:$0xff]  }
  0x7d   :  { %1191 = vmatpush3.bf16.msra.mxu1 %v1322_v59  ;;  %1170 = vmatprep.subr.bf16.mxu0 %v1323_v60  ;;  %v1350_v59 = vld [vmem:[#allocation9 + $0x38] sm:$0xff]   ;;  %v1098_v60 = vld [vmem:[%s1618_s4] ss:$0 sm:$0xff]  ;;  %s1439_s4 = scalar_lea.vmem %s1023_s29, 128 }
  0x7e   :  { %1192 = vmatprep.subr.bf16.mxu1 %v1324_v61  ;;  %p1440_p4 = scmp.ne.s32.totalorder %s1023_s29, %s1439_s4  ;;  %p1445_p6 = scmp.lt.s32.totalorder %s1439_s4, %s1439_s4 }
  0x80   :  { %1171 = vmatpush3.bf16.msra.mxu0 %v1325_v62  ;;  %p1446_p7 = por %p1445_p6, %p1444_p5 }
  0x81   :  { %1193 = vmatpush3.bf16.msra.mxu1 %v1326_v63  ;;  %1172 = vmatprep.subr.bf16.mxu0 %v1327_v0 }
  0x82   :  { %1194 = vmatprep.subr.bf16.mxu1 %v1328_v1  ;;  %p1447_p8 = pnand %p1446_p7, %p1440_p4 }
  0x84   :  { %1173 = vmatpush3.bf16.msra.mxu0 %v1329_v2 }
  0x85   :  { %1195 = vmatpush3.bf16.msra.mxu1 %v1330_v3  ;;  %1174 = vmatprep.subr.bf16.mxu0 %v1331_v4  ;;  %v1107_v4 = vld [vmem:[%s1620_s6] ss:$0 sm:$0xff] }
  0x86   :  { %1196 = vmatprep.subr.bf16.mxu1 %v1332_v5 }
  0x88   :  { %1175 = vmatpush3.bf16.msra.mxu0 %v1333_v6 }
  0x89   :  { %1197 = vmatpush3.bf16.msra.mxu1 %v1334_v7  ;;  %1222 = vmatprep.subr.bf16.mxu0 %v1475_v17 }
  0x8a   :  { %1242 = vmatprep.subr.bf16.mxu1 %v1475_v17 }
  0x8b   :  { %728 = vmatmul.mubr.bf16.vlgmr.msra.gmra.mrb[4].mxu0 %v99_v14 }
  0x8c   :  { %768 = vmatmul.mubr.bf16.vlgmr.msra.gmra.mrb[4].mxu1 %v101_v15  ;;  %1223 = vmatpush3.bf16.msra.mxu0 %v1335_v16 }
  0x8d   :  { %1224 = vmatprep.subr.bf16.mxu0 %v1475_v17  ;;  %1238 = vmatprep.mubr.msk.bf16.mxu0 %vm1476_vm0, %v1475_v17 }
  0x8e   :  { %1258 = vmatprep.mubr.msk.bf16.mxu1 %vm1476_vm0, %v1475_v17  ;;  %1243 = vmatpush3.bf16.msra.mxu1 %v1343_v25 }
  0x8f   :  { %1244 = vmatprep.subr.bf16.mxu1 %v1475_v17 }
  0x90   :  { %1225 = vmatpush3.bf16.msra.mxu0 %v1336_v18 }
  0x91   :  { %1226 = vmatprep.subr.bf16.mxu0 %v1475_v17 }
  0x92   :  { %1245 = vmatpush3.bf16.msra.mxu1 %v1344_v26 }
  0x93   :  { %1246 = vmatprep.subr.bf16.mxu1 %v1475_v17 }
  0x94   :  { %1227 = vmatpush3.bf16.msra.mxu0 %v1337_v19 }
  0x95   :  { %1228 = vmatprep.subr.bf16.mxu0 %v1475_v17 }
  0x96   :  { %1247 = vmatpush3.bf16.msra.mxu1 %v1345_v27 }
  0x97   :  { %1248 = vmatprep.subr.bf16.mxu1 %v1475_v17 }
  0x98   :  { %1229 = vmatpush3.bf16.msra.mxu0 %v1338_v20 }
  0x99   :  { %1230 = vmatprep.subr.bf16.mxu0 %v1475_v17 }
  0x9a   :  { %1249 = vmatpush3.bf16.msra.mxu1 %v1346_v28 }
  0x9b   :  { %1250 = vmatprep.subr.bf16.mxu1 %v1475_v17 }
  0x9c   :  { %1231 = vmatpush3.bf16.msra.mxu0 %v1339_v21 }
  0x9d   :  { %1232 = vmatprep.subr.bf16.mxu0 %v1475_v17 }
  0x9e   :  { %1251 = vmatpush3.bf16.msra.mxu1 %v1347_v29 }
  0x9f   :  { %1252 = vmatprep.subr.bf16.mxu1 %v1475_v17 }
  0xa0   :  { %1233 = vmatpush3.bf16.msra.mxu0 %v1340_v22 }
  0xa1   :  { %1234 = vmatprep.subr.bf16.mxu0 %v1475_v17 }
  0xa2   :  { %1253 = vmatpush3.bf16.msra.mxu1 %v1348_v30 }
  0xa3   :  { %1254 = vmatprep.subr.bf16.mxu1 %v1475_v17 }
  0xa4   :  { %1235 = vmatpush3.bf16.msra.mxu0 %v1341_v23 }
  0xa5   :  { %1236 = vmatprep.subr.bf16.mxu0 %v1475_v17 }
  0xa6   :  { %1255 = vmatpush3.bf16.msra.mxu1 %v1349_v58 }
  0xa7   :  { %1256 = vmatprep.subr.bf16.mxu1 %v1475_v17 }
  0xa8   :  { %1237 = vmatpush3.bf16.msra.mxu0 %v1342_v24 }
  0xaa   :  { %1257 = vmatpush3.bf16.msra.mxu1 %v1350_v59 }
 0x13e   :  { %v1132_v31 = vpop.f32.mrb[0].mxu0 }
 0x13f   :  { %v1154_v32 = vpop.f32.mrb[0].mxu1  ;;  %v1133_v33 = vpop.f32.mrb[1].mxu0 }
 0x140   :  { %v1155_v34 = vpop.f32.mrb[1].mxu1  ;;  %v1134_v35 = vadd.f32 %v1133_v33, %v1132_v31  ;;  %v1135_v37 = vpop.f32.mrb[2].mxu0 }
 0x141   :  { %v1156_v36 = vadd.f32 %v1155_v34, %v1154_v32  ;;  %v1157_v38 = vpop.f32.mrb[2].mxu1  ;;  %v1136_v39 = vpop.f32.mrb[3].mxu0 }
 0x142   :  { %v1158_v40 = vpop.f32.mrb[3].mxu1 }
 0x143   :  { %v690_v41 = vadd.f32 %v1156_v36, %v1134_v35 }
 0x15e   :  { %v1176_v42 = vpop.f32.mrb[4].mxu0 }
 0x15f   :  { %v1198_v43 = vpop.f32.mrb[4].mxu1  ;;  %v1177_v44 = vpop.f32.mrb[5].mxu0 }
 0x160   :  { %v1178_v45 = vadd.f32 %v1177_v44, %v1176_v42  ;;  %v1199_v46 = vpop.f32.mrb[5].mxu1  ;;  %v1179_v47 = vpop.f32.mrb[6].mxu0 }
 0x161   :  { %v1200_v48 = vadd.f32 %v1199_v46, %v1198_v43  ;;  %v1201_v49 = vpop.f32.mrb[6].mxu1  ;;  %v1180_v50 = vpop.f32.mrb[7].mxu0 }
 0x162   :  { %v730_v51 = vadd.f32 %v1178_v45, %v690_v41  ;;  %v1202_v52 = vpop.f32.mrb[7].mxu1 }
 0x164   :  { %v770_v54 = vadd.f32 %v1200_v48, %v730_v51 }
 0x166   :  { %v788_v55 = vadd.f32 %v1097_v53, %v770_v54 }
 0x168   :  { %v789_v56 = vmax.f32 %v788_v55, 0.0 }
 0x16a   :  { %v790_v57 = vpack.c.bf16 %v789_v56, %v789_v56 }
 0x16c   :  { %1239 = vmatmul.mubr.bf16.vlgmr.msra.gmra.mrb[8].mxu0 %v790_v57 }
 0x23f   :  { %v896_v61 = vpop.f32.mrb[8].mxu0 }
 0x240   :  { %v897_v62 = vadd.f32 %v1098_v60, %v896_v61  ;;  %v1240_v63 = vpop.f32.mrb[9].mxu0 }
 0x241   :  { %v899_v0 = vpop.f32.mrb[10].mxu0 }
 0x242   :  { %v902_v1 = vmax.f32 %v897_v62, 0.0  ;;  %v1241_v2 = vpop.f32.mrb[11].mxu0 }
 0x244   :  { %v903_v3 = vpack.c.bf16 %v902_v1, %v902_v1 }
 0x246   :  { %1259 = vmatmul.mubr.bf16.vlgmr.msra.gmra.mrb[8].mxu1 %v903_v3 }
 0x319   :  { %v1009_v5 = vpop.f32.mrb[8].mxu1 }
 0x31a   :  { %v1010_v6 = vadd.f32 %v1107_v4, %v1009_v5  ;;  %v1260_v7 = vpop.f32.mrb[9].mxu1 }
 0x31b   :  { %v1012_v8 = vpop.f32.mrb[10].mxu1 }
 0x31c   :  { %1015 = vst [vmem:[#allocation11] sm:$0xff] %v1010_v6  ;;  %v1261_v9 = vpop.f32.mrb[11].mxu1 }
 0x31d   :  { %1450 = shalt.err (!%p1447_p8)
}
 0x31e   :  { %s1451_s6 = scalar_lea.hbm %s1621_s7, 128 }
 0x31f   :  { %p1452_p9 = scmp.ne.s32.totalorder %s1621_s7, %s1451_s6  ;;  %p1455_p10 = scmp.lt.u32.totalorder %s1451_s6, %s1621_s7 }
 0x321   :  { %p1457_p11 = pnand %p1455_p10, %p1452_p9 }
 0x323   :  { %1460 = shalt.err (!%p1457_p11)
}
 0x324   :  { %1025 = dma.vmem_to_hbm [thread:$0]  %s1023_s29, 128, %s1621_s7, [#allocation5]  }
 0x325   :  { %1467 = dma.done.wait [#allocation5], 128  }
 0x326   :  { %1468 = vsyncadd [#allocation5], 4294967168 }
 0x327   :  { %1029 = vsyncpa [#allocation4], 1 }
 0x328   :  { %1030 = vsyncpa [#allocation7], 1 }
 0x329   :  { %1031 = vsyncpa [#allocation10], 1 }
 0x32a   :  { %1032 = vsyncpa [#allocation5], 1 }

</bundles_post_ra>
